<compile_context>
chip_gen: v7x
topology: tpu7x:2x2x1
jax: 0.10.0
libtpu: 0.0.40
codegen_flags: <defaults>
</compile_context>

<pallas_src>
import functools
import math

import jax
import jax.numpy as jnp
from jax import lax
from jax.experimental import pallas as pl
from jax.experimental.pallas import tpu as pltpu


def _round_up(x: int, m: int) -> int:
    return ((x + m - 1) // m) * m


def _vmem_capacity_bytes() -> int:
    try:
        return int(pltpu.get_tpu_info().vmem_capacity_bytes)
    except Exception:
        return 64 * 1024 * 1024  # conservative default (v7x per-core VMEM)


def _default_vocab_resident_max() -> int:
    # The one-hot gather costs 2*vocab*d_model MXU FLOPs per token, so the
    # crossover vs. the HBM row gather comes much earlier on pre-v6 MXUs.
    try:
        kind = jax.devices()[0].device_kind.lower()
    except Exception:
        kind = ""
    if any(v in kind for v in ("v2", "v3", "v4", "v5")):
        return 2048
    return 8192


def _choose_block_tokens(n_tokens: int, target: int) -> int:
    if n_tokens <= 128:
        return _round_up(n_tokens, 8)          # single small block
    # Lane/sublane-dense tile; cap near N/2 so the "parallel" token axis spans
    # both v7x TensorCores whenever N is non-trivial.
    half = -(-n_tokens // 2)
    return max(128, _round_up(min(target, half), 128))


# ---------------------------------------------------------------------------
# Path 1: VMEM-resident table (small / medium vocab), vocab-chunked one-hot.
# ---------------------------------------------------------------------------
def _embed_resident_kernel(ids_ref, table_ref, out_ref, *, scale, vocab_chunk):
    # ids_ref:   VMEM (T, 1)              int32 token ids for this token block
    # table_ref: VMEM (vocab_pad, d_pad)  full table, resident (constant index)
    # out_ref:   VMEM (T, d_pad)          output rows for this token block
    ids = ids_ref[...]                          # (T, 1) int32
    tokens, d = out_ref.shape
    vocab_pad = table_ref.shape[0]
    n_chunks = vocab_pad // vocab_chunk
    onehot_dtype = table_ref.dtype
    # f32 table: HIGHEST keeps the 0/1 one-hot gather exact (default precision
    # may truncate the table to bf16 inside the MXU).  bf16 table: a bf16
    # one-hot is exact and runs at the native single-pass MXU rate.
    precision = (lax.Precision.HIGHEST
                 if table_ref.dtype == jnp.float32 else None)

    def chunk_body(c, acc):
        v0 = pl.multiple_of(c * vocab_chunk, vocab_chunk)
        onehot = (lax.broadcasted_iota(jnp.int32, (tokens, vocab_chunk), 1)
                  == (ids - v0)).astype(onehot_dtype)
        return acc + jnp.dot(onehot, table_ref[pl.ds(v0, vocab_chunk), :],
                             preferred_element_type=jnp.float32,
                             precision=precision)

    acc = lax.fori_loop(0, n_chunks, chunk_body,
                        jnp.zeros((tokens, d), jnp.float32))
    out_ref[...] = (acc * scale).astype(out_ref.dtype)


# ---------------------------------------------------------------------------
# Path 2: table stays in HBM; deep ring of row DMAs straight into the out tile.
# ---------------------------------------------------------------------------
def _embed_hbm_kernel(idx_ref, table_hbm, out_ref, sems, *,
                      scale, tokens, inflight, unroll):
    # idx_ref:   SMEM (num_blocks, T) int32 (scalar prefetch)
    # table_hbm: HBM  (vocab, d_pad)  raw ref (memory_space=pl.ANY)
    # out_ref:   VMEM (T, d_pad)      rows are DMA'd straight into this tile
    # sems:      ring of `inflight` DMA semaphores (inflight is a power of two)
    blk = pl.program_id(0)
    mask = inflight - 1

    def start(t, tok):
        pltpu.make_async_copy(
            table_hbm.at[pl.ds(tok, 1), :],
            out_ref.at[pl.ds(t, 1), :],
            sems.at[t & mask]).start()

    def wait(t):
        # Dummy src slice only fixes the transfer shape (one row); the sem slot
        # identifies which in-flight copy is waited on.  Shape/dtype must match
        # start() exactly.
        pltpu.make_async_copy(
            table_hbm.at[pl.ds(0, 1), :],
            out_ref.at[pl.ds(t, 1), :],
            sems.at[t & mask]).wait()

    # Prime the ring with `inflight` outstanding row copies (static unroll).
    for t in range(inflight):
        start(t, idx_ref[blk, t])

    # Steady state: wait row t, immediately refill with row t + inflight.
    # Refill ids are read from SMEM *before* any .wait() in the chunk.
    n_refill = tokens - inflight

    def refill_chunk(i, carry):
        base = i * unroll
        toks = [idx_ref[blk, base + u + inflight] for u in range(unroll)]
        for u in range(unroll):
            t = base + u
            wait(t)
            start(t + inflight, toks[u])
        return carry

    if n_refill > 0:
        lax.fori_loop(0, n_refill // unroll, refill_chunk, 0)

    # Drain the tail (static unroll).
    for t in range(n_refill, tokens):
        wait(t)

    # sqrt(d_model) scale applied in place (free VPU work in a DMA-bound kernel).
    out_ref[...] = out_ref[...] * scale


# ---------------------------------------------------------------------------
# Wrapper
# ---------------------------------------------------------------------------
def embeddings_forward(x, table, *, block_tokens=None, inflight=32,
                       force_path=None, vocab_resident_max=None):
    """x: (B, S) int token ids; table: (vocab, d_model). Returns (B, S, d_model)."""
    B, S = x.shape
    vocab, d_model = table.shape
    N = B * S
    scale = math.sqrt(d_model)
    itemsize = jnp.dtype(table.dtype).itemsize
    vmem_cap = _vmem_capacity_bytes()
    if vocab_resident_max is None:
        vocab_resident_max = _default_vocab_resident_max()

    # Lane-dense last dim: pad d_model up to a multiple of 128 once; the pad
    # columns are sliced off at the end.
    d_pad = _round_up(d_model, 128)
    table_p = (table if d_pad == d_model
               else jnp.pad(table, ((0, 0), (0, d_pad - d_model))))

    vocab_chunk = 512 if vocab > 512 else _round_up(vocab, 8)
    vocab_pad = _round_up(vocab, vocab_chunk)
    table_vmem_bytes = vocab_pad * d_pad * itemsize

    T_res = _choose_block_tokens(N, 256 if block_tokens is None else block_tokens)
    T_hbm = _choose_block_tokens(N, 512 if block_tokens is None else block_tokens)

    def resident_bytes(T, table_bufs):
        return (table_bufs * table_vmem_bytes     # resident table buffer(s)
                + 2 * T * d_pad * itemsize        # double-buffered out tile
                + 2 * T * 128 * 4                 # ids tiles ((T,1) lane-padded)
                + T * vocab_chunk * 8             # per-chunk iota + one-hot temps
                + T * d_pad * 4)                  # f32 accumulator

    if force_path is not None:
        use_resident = (force_path == "resident")
    else:
        use_resident = (vocab <= vocab_resident_max
                        and resident_bytes(T_res, 1) <= int(0.7 * vmem_cap))

    def padded_flat_ids(n_pad):
        idx = x.reshape(N).astype(jnp.int32)
        if n_pad != N:
            idx = jnp.concatenate([idx, jnp.zeros((n_pad - N,), jnp.int32)])
        return idx

    out_flat = None

    # ---------------- resident-table path ----------------
    if use_resident:
        T = T_res
        N_pad = _round_up(N, T)
        num_blocks = N_pad // T
        ids2d = padded_flat_ids(N_pad).reshape(N_pad, 1)
        table_r = (table_p if vocab_pad == vocab
                   else jnp.pad(table_p, ((0, vocab_pad - vocab), (0, 0))))

        def call_resident(single_buffer):
            spec_kwargs = ({"pipeline_mode": pl.Buffered(1)}
                           if single_buffer else {})
            need = resident_bytes(T, 1 if single_buffer else 2)
            vmem_limit = min(int(0.9 * vmem_cap),
                             max(32 * 1024 * 1024, int(1.25 * need)))
            return pl.pallas_call(
                functools.partial(_embed_resident_kernel, scale=scale,
                                  vocab_chunk=vocab_chunk),
                out_shape=jax.ShapeDtypeStruct((N_pad, d_pad), table.dtype),
                grid_spec=pltpu.PrefetchScalarGridSpec(
                    num_scalar_prefetch=0,
                    grid=(num_blocks,),
                    in_specs=[
                        pl.BlockSpec((T, 1), lambda i: (i, 0)),            # ids
                        pl.BlockSpec((vocab_pad, d_pad), lambda i: (0, 0),
                                     **spec_kwargs),                       # table
                    ],
                    out_specs=pl.BlockSpec((T, d_pad), lambda i: (i, 0)),
                ),
                compiler_params=pltpu.CompilerParams(
                    dimension_semantics=("parallel",),
                    vmem_limit_bytes=vmem_limit,
                ),
            )(ids2d, table_r)

        if hasattr(pl, "Buffered"):
            try:
                out_flat = call_resident(True)     # single-buffered table
            except Exception:
                out_flat = None                    # fall back below
        if out_flat is None:
            if (force_path == "resident"
                    or resident_bytes(T, 2) <= int(0.85 * vmem_cap)):
                out_flat = call_resident(False)    # default double buffering
            # else: fall through to the HBM path.

    # ---------------- HBM row-gather path ----------------
    if out_flat is None:
        T = T_hbm
        N_pad = _round_up(N, T)
        num_blocks = N_pad // T
        idx2d = padded_flat_ids(N_pad).reshape(num_blocks, T)

        # DMA ring depth: power of two, multiple of 8, <= T.
        K = 1 << (max(8, min(inflight, T)).bit_length() - 1)
        n_refill = T - K
        unroll = 8
        while unroll > 1 and n_refill % unroll:
            unroll //= 2

        hbm_need = 2 * T * d_pad * itemsize + (1 << 20)
        vmem_limit = min(int(0.9 * vmem_cap),
                         max(32 * 1024 * 1024, int(1.5 * hbm_need)))
        out_flat = pl.pallas_call(
            functools.partial(_embed_hbm_kernel, scale=scale, tokens=T,
                              inflight=K, unroll=unroll),
            out_shape=jax.ShapeDtypeStruct((N_pad, d_pad), table.dtype),
            grid_spec=pltpu.PrefetchScalarGridSpec(
                num_scalar_prefetch=1,
                grid=(num_blocks,),
                in_specs=[pl.BlockSpec(memory_space=pl.ANY)],      # table in HBM
                out_specs=pl.BlockSpec((T, d_pad), lambda i, idx: (i, 0)),
                scratch_shapes=[pltpu.SemaphoreType.DMA((K,))],
            ),
            compiler_params=pltpu.CompilerParams(
                dimension_semantics=("parallel",),
                vmem_limit_bytes=vmem_limit,
            ),
        )(idx2d, table_p)

    return out_flat[:N, :d_model].reshape(B, S, d_model)


if __name__ == "__main__":
    key = jax.random.PRNGKey(0)

    configs = [
        # (vocab, d_model, B, S) -- small shapes consistent with the module
        (64, 128, 2, 8),     # single-block, d_model already lane-aligned
        (1000, 96, 2, 72),   # multi-block + vocab chunking + d_model padding
    ]

    for (vocab, d_model, B, S) in configs:
        key, k_w, k_x = jax.random.split(key, 3)
        # nn.Embedding default init: weight ~ N(0, 1)
        table = jax.random.normal(k_w, (vocab, d_model), dtype=jnp.float32)
        x = jax.random.randint(k_x, (B, S), 0, vocab, dtype=jnp.int32)

        ref = jnp.take(table, x, axis=0) * math.sqrt(d_model)

        # Exercise BOTH gather paths and verify each against the reference.
        for path in ("resident", "hbm"):
            out = jax.block_until_ready(
                embeddings_forward(x, table, force_path=path))
            assert out.shape == (B, S, d_model), (path, out.shape)
            assert out.dtype == table.dtype, (path, out.dtype)
            assert jnp.allclose(out, ref, atol=1e-5, rtol=1e-5), (path, vocab)

    print("KERNEL_OK")
</pallas_src>

<mosaic_0001>
module attributes {stable_mosaic.version = 11 : i64} {
  func.func @_embed_resident_kernel(%arg0: i32, %arg1: memref<16x1xi32, #tpu.memory_space<vmem>>, %arg2: memref<64x128xf32, #tpu.memory_space<vmem>>, %arg3: memref<16x128xf32, #tpu.memory_space<vmem>>) attributes {dimension_semantics = [#tpu.dimension_semantics<parallel>], iteration_bounds = array<i64: 1>, scalar_prefetch = 0 : i64, scratch_operands = 0 : i64, tpu.core_type = #tpu.core_type<tc>, window_params = [{transform_indices = @transform_0, window_bounds = array<i64: 16, 1>}, {pipeline_mode = #tpu.pipeline_mode<synchronous>, transform_indices = @transform_1, window_bounds = array<i64: 64, 128>}, {transform_indices = @transform_2, window_bounds = array<i64: 16, 128>}]} {
    %c0 = arith.constant 0 : index
    %c0_0 = arith.constant 0 : index
    %0 = vector.load %arg1[%c0, %c0_0] : memref<16x1xi32, #tpu.memory_space<vmem>>, vector<16x1xi32>
    %cst = arith.constant 0.000000e+00 : f32
    %1 = vector.broadcast %cst : f32 to vector<16x128xf32>
    %c0_i32 = arith.constant 0 : i32
    %c64_i32 = arith.constant 64 : i32
    %2 = arith.muli %c0_i32, %c64_i32 : i32
    %3 = tpu.assume_multiple %2, 64 : i32
    %4 = tpu.iota {dimensions = array<i32: 1>} : vector<16x64xi32>
    %5 = vector.broadcast %3 : i32 to vector<16x1xi32>
    %6 = arith.subi %0, %5 : vector<16x1xi32>
    %7 = vector.broadcast %6 : vector<16x1xi32> to vector<16x64xi32>
    %8 = arith.cmpi eq, %4, %7 : vector<16x64xi32>
    %9 = arith.extui %8 : vector<16x64xi1> to vector<16x64xi32>
    %10 = arith.sitofp %9 : vector<16x64xi32> to vector<16x64xf32>
    %11 = arith.index_cast %3 : i32 to index
    %c0_1 = arith.constant 0 : index
    %12 = vector.load %arg2[%11, %c0_1] : memref<64x128xf32, #tpu.memory_space<vmem>>, vector<64x128xf32>
    %cst_2 = arith.constant dense<0.000000e+00> : vector<16x128xf32>
    %13 = tpu.matmul %10, %12, %cst_2 {dimension_numbers = #tpu.dot_dimension_numbers<[1], [0], [0], [1], [0, 0, 1, 1], [], []>, precision = #tpu.contract_precision<fp32>} : vector<16x64xf32>, vector<64x128xf32>, vector<16x128xf32> -> vector<16x128xf32>
    %14 = arith.addf %1, %13 : vector<16x128xf32>
    %c1_i32 = arith.constant 1 : i32
    %cst_3 = arith.constant 11.3137083 : f32
    %15 = vector.broadcast %cst_3 : f32 to vector<16x128xf32>
    %16 = arith.mulf %14, %15 : vector<16x128xf32>
    %c0_4 = arith.constant 0 : index
    %c0_5 = arith.constant 0 : index
    %17 = vector.load %arg3[%c0_4, %c0_5] : memref<16x128xf32, #tpu.memory_space<vmem>>, vector<16x128xf32>
    tpu.vector_store %arg3[%c0_4, %c0_5], %16 {strides = array<i32>} : memref<16x128xf32, #tpu.memory_space<vmem>>, vector<16x128xf32>,
    return
  }
  func.func @transform_0(%arg0: i32) -> (i32, i32) {
    %c0_i32 = arith.constant 0 : i32
    %c0_i32_0 = arith.constant 0 : i32
    return %arg0, %c0_i32 : i32, i32
  }
  func.func @transform_1(%arg0: i32) -> (i32, i32) {
    %c0_i32 = arith.constant 0 : i32
    %c0_i32_0 = arith.constant 0 : i32
    %c0_i32_1 = arith.constant 0 : i32
    return %c0_i32, %c0_i32_0 : i32, i32
  }
  func.func @transform_2(%arg0: i32) -> (i32, i32) {
    %c0_i32 = arith.constant 0 : i32
    %c0_i32_0 = arith.constant 0 : i32
    return %arg0, %c0_i32 : i32, i32
  }
}

module attributes {stable_mosaic.version = 11 : i64} {
  func.func @_embed_resident_kernel(%arg0: i32, %arg1: memref<16x1xi32, #tpu.memory_space<vmem>>, %arg2: memref<64x128xf32, #tpu.memory_space<vmem>>, %arg3: memref<16x128xf32, #tpu.memory_space<vmem>>) attributes {dimension_semantics = [#tpu.dimension_semantics<parallel>], iteration_bounds = array<i64: 1>, scalar_prefetch = 0 : i64, scratch_operands = 0 : i64, tpu.core_type = #tpu.core_type<tc>, window_params = [{transform_indices = @transform_0, window_bounds = array<i64: 16, 1>}, {pipeline_mode = #tpu.pipeline_mode<synchronous>, transform_indices = @transform_1, window_bounds = array<i64: 64, 128>}, {transform_indices = @transform_2, window_bounds = array<i64: 16, 128>}]} {
    %c0 = arith.constant 0 : index
    %c0_0 = arith.constant 0 : index
    %0 = vector.load %arg1[%c0, %c0_0] : memref<16x1xi32, #tpu.memory_space<vmem>>, vector<16x1xi32>
    %cst = arith.constant 0.000000e+00 : f32
    %1 = vector.broadcast %cst : f32 to vector<16x128xf32>
    %c0_i32 = arith.constant 0 : i32
    %c64_i32 = arith.constant 64 : i32
    %2 = arith.muli %c0_i32, %c64_i32 : i32
    %3 = tpu.assume_multiple %2, 64 : i32
    %4 = tpu.iota {dimensions = array<i32: 1>} : vector<16x64xi32>
    %5 = vector.broadcast %3 : i32 to vector<16x1xi32>
    %6 = arith.subi %0, %5 : vector<16x1xi32>
    %7 = vector.broadcast %6 : vector<16x1xi32> to vector<16x64xi32>
    %8 = arith.cmpi eq, %4, %7 : vector<16x64xi32>
    %9 = arith.extui %8 : vector<16x64xi1> to vector<16x64xi32>
    %10 = arith.sitofp %9 : vector<16x64xi32> to vector<16x64xf32>
    %11 = arith.index_cast %3 : i32 to index
    %c0_1 = arith.constant 0 : index
    %12 = vector.load %arg2[%11, %c0_1] : memref<64x128xf32, #tpu.memory_space<vmem>>, vector<64x128xf32>
    %cst_2 = arith.constant dense<0.000000e+00> : vector<16x128xf32>
    %13 = tpu.matmul %10, %12, %cst_2 {dimension_numbers = #tpu.dot_dimension_numbers<[1], [0], [0], [1], [0, 0, 1, 1], [], []>, precision = #tpu.contract_precision<fp32>} : vector<16x64xf32>, vector<64x128xf32>, vector<16x128xf32> -> vector<16x128xf32>
    %14 = arith.addf %1, %13 : vector<16x128xf32>
    %c1_i32 = arith.constant 1 : i32
    %cst_3 = arith.constant 11.3137083 : f32
    %15 = vector.broadcast %cst_3 : f32 to vector<16x128xf32>
    %16 = arith.mulf %14, %15 : vector<16x128xf32>
    %c0_4 = arith.constant 0 : index
    %c0_5 = arith.constant 0 : index
    %17 = vector.load %arg3[%c0_4, %c0_5] : memref<16x128xf32, #tpu.memory_space<vmem>>, vector<16x128xf32>
    tpu.vector_store %arg3[%c0_4, %c0_5], %16 {strides = array<i32>} : memref<16x128xf32, #tpu.memory_space<vmem>>, vector<16x128xf32>,
    return
  }
  func.func @transform_0(%arg0: i32) -> (i32, i32) {
    %c0_i32 = arith.constant 0 : i32
    %c0_i32_0 = arith.constant 0 : i32
    return %arg0, %c0_i32 : i32, i32
  }
  func.func @transform_1(%arg0: i32) -> (i32, i32) {
    %c0_i32 = arith.constant 0 : i32
    %c0_i32_0 = arith.constant 0 : i32
    %c0_i32_1 = arith.constant 0 : i32
    return %c0_i32, %c0_i32_0 : i32, i32
  }
  func.func @transform_2(%arg0: i32) -> (i32, i32) {
    %c0_i32 = arith.constant 0 : i32
    %c0_i32_0 = arith.constant 0 : i32
    return %arg0, %c0_i32 : i32, i32
  }
}

</mosaic_0001>

<bundles_post_ra>
// kernel: tpu_custom_call.1
= control target key start
LH: loop header
LB: loop body
LE: loop exit
PB: predicated region body
PF: predicated region fallthrough
CT: control target
= control target key end

     0   :  { %7 = vsyncpa [#allocation3], 0  ;;  %s1105_s0 = inlined_call_operand.vmem [shape: s32[16,1], index: 0, kind: input, shape index: {}]   ;;  %s1106_s1 = inlined_call_operand.hbm [shape: f32[64,128], index: 1, kind: input, shape index: {}]   ;;  %s1107_s2 = inlined_call_operand.hbm [shape: f32[16,128], index: 2, kind: output, shape index: {}]  }
   0x1   :  { %8 = vsyncpa [#allocation4], 0  ;;  %s1004_s9 = smov [#allocation2]   ;;  %s956_s13 = scalar_lea.hbm %s1106_s1, 1024 }
   0x2   :  { %s16_s10 = sshll.u32 %s1004_s9, 4  ;;  %p957_p0 = scmp.ne.s32.totalorder %s1106_s1, %s956_s13  ;;  %s17_s10 = int_to_ptr.vmem [resolvable:$true] %s16_s10 }
   0x3   :  { %p960_p1 = scmp.lt.u32.totalorder %s956_s13, %s1106_s1 }
   0x5   :  { %p962_p2 = pnand %p960_p1, %p957_p0 }
   0x7   :  { %965 = shalt.err (!%p962_p2)
}
   0x8   :  { %s966_s18 = scalar_lea.vmem %s17_s10, 1024  ;;  %p971_p4 = scmp.lt.s32.totalorder %s17_s10, %s17_s10 }
   0x9   :  { %p967_p3 = scmp.ne.s32.totalorder %s17_s10, %s966_s18  ;;  %p972_p5 = scmp.lt.s32.totalorder %s966_s18, %s966_s18 }
   0xb   :  { %p973_p6 = por %p972_p5, %p971_p4 }
   0xd   :  { %p974_p7 = pnand %p973_p6, %p967_p3 }
   0xf   :  { %977 = shalt.err (!%p974_p7)
}
  0x10   :  { %s1005_s19 = smov 128   ;;  %s1006_s20 = smov 8  }
  0x11   :  { %22 = dma.hbm_to_vmem [thread:$0]  %s1106_s1, 1024, %s17_s10, [#allocation3], %s1005_s19, %s1005_s19, %s1006_s20  }
  0x12   :  { %1000 = dma.done.wait [#allocation3], 1024  }
  0x13   :  { %1001 = vsyncadd [#allocation3], 4294966272  ;;  %v1007_v0 = vmov 0   ;;  %v26_v1 = vld [vmem:[%s1105_s0] sm:$0xff]  ;;  %v46_v3 = vld [vmem:[#allocation2 + $0x8] sm:$0xff]  ;;  %vm53_vm0 = vcmask 523264  }
  0x14   :  { %955 = vset.pattern.permute.xlu0 %v1007_v0  ;;  %v45_v2 = vld [vmem:[#allocation2] sm:$0xff]  ;;  %v47_v5 = vld [vmem:[#allocation2 + $0x10] sm:$0xff]  ;;  %v48_v6 = vld [vmem:[#allocation2 + $0x18] sm:$0xff]  ;;  %v64_v8 = vand.u32 4294901760, %v46_v3 }
  0x15   :  { %34 = vperm.xlu0 %955, %v26_v1   ;;  %v61_v4 = vand.u32 4294901760, %v45_v2  ;;  %v27_v7 = vld [vmem:[%s1105_s0 + $0x8] sm:$0xff]  ;;  %v67_v9 = vand.u32 4294901760, %v47_v5  ;;  %v70_v10 = vand.u32 4294901760, %v48_v6  ;;  %v49_v11 = vld [vmem:[#allocation2 + $0x20] sm:$0xff]  ;;  %v51_v17 = vld [vmem:[#allocation2 + $0x30] sm:$0xff] }
  0x16   :  { %v50_v12 = vld [vmem:[#allocation2 + $0x28] sm:$0xff]  ;;  %v73_v15 = vand.u32 4294901760, %v49_v11  ;;  %v52_v18 = vld [vmem:[#allocation2 + $0x38] sm:$0xff]  ;;  %v162_v20 = vsub.f32 %v46_v3, %v64_v8  ;;  %v79_v21 = vand.u32 4294901760, %v51_v17  ;;  %v28_v3 = vlaneseq  ;;  %s1009_s0 = smov [#allocation5]  }
  0x17   :  { %v1046_v13 = vpack.c.bf16 %v64_v8, %v61_v4  ;;  %v1048_v14 = vpack.c.bf16 %v70_v10, %v67_v9  ;;  %v76_v16 = vand.u32 4294901760, %v50_v12  ;;  %v155_v19 = vsub.f32 %v45_v2, %v61_v4  ;;  %s649_s1 = sshll.u32 %s1009_s0, 4  ;;  %s650_s1 = int_to_ptr.vmem [resolvable:$true] %s649_s1 }
  0x18   :  { %v82_v22 = vand.u32 4294901760, %v52_v18  ;;  %v163_v24 = vand.u32 4294901760, %v162_v20  ;;  %v169_v28 = vsub.f32 %v47_v5, %v67_v9  ;;  %v176_v29 = vsub.f32 %v48_v6, %v70_v10  ;;  %s978_s27 = scalar_lea.vmem %s650_s1, 256  ;;  %p983_p9 = scmp.lt.s32.totalorder %s650_s1, %s650_s1 }
  0x19   :  { %37 = vperm.xlu0 %955, %v27_v7   ;;  %892 = vmatprep.subr.bf16.mxu0 %v1046_v13  ;;  %v156_v23 = vand.u32 4294901760, %v155_v19  ;;  %v1056_v25 = vpack.c.bf16 %v76_v16, %v73_v15  ;;  %v183_v38 = vsub.f32 %v49_v11, %v73_v15  ;;  %v190_v39 = vsub.f32 %v50_v12, %v76_v16  ;;  %p979_p8 = scmp.ne.s32.totalorder %s650_s1, %s978_s27  ;;  %p984_p10 = scmp.lt.s32.totalorder %s978_s27, %s978_s27 }
  0x1a   :  { %844 = vmatprep.subr.bf16.mxu1 %v1046_v13  ;;  %894 = vmatpush3.bf16.msra.mxu0 %v1046_v13  ;;  %v164_v27 = vsub.f32 %v162_v20, %v163_v24  ;;  %v1060_v30 = vpack.c.bf16 %v82_v22, %v79_v21  ;;  %v170_v33 = vand.u32 4294901760, %v169_v28  ;;  %v177_v34 = vand.u32 4294901760, %v176_v29 }
  0x1b   :  { %846 = vmatpush3.bf16.msra.mxu1 %v1046_v13  ;;  %896 = vmatprep.subr.bf16.mxu0 %v1048_v14  ;;  %v157_v26 = vsub.f32 %v155_v19, %v156_v23  ;;  %v907_v40 = vpack.c.bf16 %v163_v24, %v156_v23  ;;  %v184_v44 = vand.u32 4294901760, %v183_v38  ;;  %v191_v45 = vand.u32 4294901760, %v190_v39  ;;  %p985_p11 = por %p984_p10, %p983_p9 }
  0x1c   :  { %848 = vmatprep.subr.bf16.mxu1 %v1048_v14  ;;  %v165_v32 = vand.u32 4294901760, %v164_v27  ;;  %v1064_v35 = vpack.c.bf16 %v177_v34, %v170_v33  ;;  %v171_v36 = vsub.f32 %v169_v28, %v170_v33  ;;  %v178_v37 = vsub.f32 %v176_v29, %v177_v34 }
  0x1d   :  { %v158_v31 = vand.u32 4294901760, %v157_v26  ;;  %v197_v47 = vsub.f32 %v51_v17, %v79_v21  ;;  %v204_v48 = vsub.f32 %v52_v18, %v82_v22  ;;  %v915_v49 = vpack.c.bf16 %v191_v45, %v184_v44  ;;  %p986_p12 = pnand %p985_p11, %p979_p8 }
  0x1e   :  { %898 = vmatpush3.bf16.msra.mxu0 %v1048_v14  ;;  %v172_v42 = vand.u32 4294901760, %v171_v36  ;;  %v179_v43 = vand.u32 4294901760, %v178_v37  ;;  %v185_v50 = vsub.f32 %v183_v38, %v184_v44  ;;  %v192_v51 = vsub.f32 %v190_v39, %v191_v45 }
  0x1f   :  { %850 = vmatpush3.bf16.msra.mxu1 %v1048_v14  ;;  %900 = vmatprep.subr.bf16.mxu0 %v1056_v25  ;;  %v859_v41 = vpack.c.bf16 %v165_v32, %v158_v31  ;;  %v198_v52 = vand.u32 4294901760, %v197_v47  ;;  %v205_v53 = vand.u32 4294901760, %v204_v48  ;;  %v875_v63 = vpack.c.bf16 %v162_v20, %v155_v19 }
  0x20   :  { %852 = vmatprep.subr.bf16.mxu1 %v1056_v25  ;;  %v863_v46 = vpack.c.bf16 %v179_v43, %v172_v42  ;;  %v186_v54 = vand.u32 4294901760, %v185_v50  ;;  %v193_v55 = vand.u32 4294901760, %v192_v51  ;;  %v879_v0 = vpack.c.bf16 %v176_v29, %v169_v28 }
  0x21   :  { %v919_v56 = vpack.c.bf16 %v205_v53, %v198_v52  ;;  %v199_v57 = vsub.f32 %v197_v47, %v198_v52  ;;  %v206_v58 = vsub.f32 %v204_v48, %v205_v53  ;;  %v883_v1 = vpack.c.bf16 %v190_v39, %v183_v38 }
  0x22   :  { %902 = vmatpush3.bf16.msra.mxu0 %v1056_v25  ;;  %v867_v59 = vpack.c.bf16 %v193_v55, %v186_v54  ;;  %v887_v2 = vpack.c.bf16 %v204_v48, %v197_v47  ;;  %v29_v4 = vand.u32 127, %v28_v3  ;;  %v1008_v6 = vmov 0.0  }
  0x23   :  { %854 = vmatpush3.bf16.msra.mxu1 %v1056_v25  ;;  %904 = vmatprep.subr.bf16.mxu0 %v1060_v30  ;;  %v200_v60 = vand.u32 4294901760, %v199_v57  ;;  %v207_v61 = vand.u32 4294901760, %v206_v58 }
  0x24   :  { %856 = vmatprep.subr.bf16.mxu1 %v1060_v30 }
  0x25   :  { %v871_v62 = vpack.c.bf16 %v207_v61, %v200_v60 }
  0x26   :  { %906 = vmatpush3.bf16.msra.mxu0 %v1060_v30 }
  0x27   :  { %858 = vmatpush3.bf16.msra.mxu1 %v1060_v30  ;;  %908 = vmatprep.subr.bf16.mxu0 %v907_v40 }
  0x28   :  { %860 = vmatprep.subr.bf16.mxu1 %v859_v41 }
  0x94   :  { %v35_v5 = vpop.permute.xlu0 %34 }
  0x95   :  { %vm39_vm1 = vcmp.eq.s32.totalorder %v29_v4, %v35_v5 }
  0x96   :  { %v661_v7 = vsel %vm39_vm1, 1.0, %v1008_v6 }
  0x97   :  { %v55_v8 = vsel %vm53_vm0, %v661_v7, 0 }
  0x98   :  { %v134_v9 = vsub.f32 %v55_v8, %v55_v8  ;;  %v38_v10 = vpop.permute.xlu0 %37 }
  0x99   :  { %vm40_vm2 = vcmp.eq.s32.totalorder %v29_v4, %v38_v10 }
  0x9a   :  { %v662_v11 = vsel %vm40_vm2, 1.0, %v1008_v6  ;;  %v135_v12 = vand.u32 4294901760, %v134_v9 }
  0x9b   :  { %v58_v15 = vsel %vm53_vm0, %v662_v11, 0 }
  0x9c   :  { %v144_v16 = vsub.f32 %v58_v15, %v58_v15  ;;  %802 = vmatprep.mubr.f32.mxu0 %v135_v12  ;;  %v136_v17 = vsub.f32 %v134_v9, %v135_v12 }
  0x9e   :  { %v137_v18 = vand.u32 4294901760, %v136_v17  ;;  %v145_v19 = vand.u32 4294901760, %v144_v16 }
  0xa0   :  { %745 = vmatprep.mubr.f32.mxu1 %v137_v18  ;;  %803 = vmatmul.mubr.f32.vlgmr.msra.gmra.mrb[0].mxu0 %v145_v19  ;;  %v146_v20 = vsub.f32 %v144_v16, %v145_v19 }
  0xa1   :  { %910 = vmatpush3.bf16.msra.mxu0 %v907_v40  ;;  %821 = vmatprep.mubr.msk.f32.mxu0 %vm53_vm0, %v661_v7 }
  0xa2   :  { %912 = vmatprep.subr.bf16.mxu0 %v1064_v35  ;;  %v147_v21 = vand.u32 4294901760, %v146_v20 }
  0xa4   :  { %746 = vmatmul.mubr.f32.vlgmr.msra.gmra.mrb[0].mxu1 %v147_v21 }
  0xa5   :  { %862 = vmatpush3.bf16.msra.mxu1 %v859_v41  ;;  %914 = vmatpush3.bf16.msra.mxu0 %v1064_v35 }
  0xa6   :  { %764 = vmatprep.mubr.msk.f32.mxu1 %vm53_vm0, %v661_v7  ;;  %864 = vmatprep.subr.bf16.mxu1 %v863_v46 }
  0xa7   :  { %916 = vmatprep.subr.bf16.mxu0 %v915_v49 }
  0xa9   :  { %866 = vmatpush3.bf16.msra.mxu1 %v863_v46  ;;  %918 = vmatpush3.bf16.msra.mxu0 %v915_v49 }
  0xaa   :  { %868 = vmatprep.subr.bf16.mxu1 %v867_v59  ;;  %920 = vmatprep.subr.bf16.mxu0 %v919_v56 }
  0xad   :  { %870 = vmatpush3.bf16.msra.mxu1 %v867_v59  ;;  %922 = vmatpush3.bf16.msra.mxu0 %v919_v56 }
  0xae   :  { %872 = vmatprep.subr.bf16.mxu1 %v871_v62  ;;  %924 = vmatprep.subr.bf16.mxu0 %v1046_v13 }
  0xb0   :  { %822 = vmatmul.mubr.msk.f32.vlgmr.msra.gmra.mrb[0].mxu0 %vm53_vm0, %v662_v11 }
  0xb1   :  { %874 = vmatpush3.bf16.msra.mxu1 %v871_v62  ;;  %926 = vmatpush3.bf16.msra.mxu0 %v1046_v13 }
  0xb2   :  { %840 = vmatprep.mubr.msk.f32.mxu0 %vm53_vm0, %v661_v7  ;;  %876 = vmatprep.subr.bf16.mxu1 %v875_v63 }
  0xb3   :  { %928 = vmatprep.subr.bf16.mxu0 %v1048_v14 }
  0xb4   :  { %765 = vmatmul.mubr.msk.f32.vlgmr.msra.gmra.mrb[0].mxu1 %vm53_vm0, %v662_v11 }
  0xb5   :  { %878 = vmatpush3.bf16.msra.mxu1 %v875_v63  ;;  %783 = vmatprep.mubr.f32.mxu1 %v134_v9 }
  0xb6   :  { %930 = vmatpush3.bf16.msra.mxu0 %v1048_v14  ;;  %880 = vmatprep.subr.bf16.mxu1 %v879_v0 }
  0xb7   :  { %932 = vmatprep.subr.bf16.mxu0 %v1056_v25 }
  0xb9   :  { %882 = vmatpush3.bf16.msra.mxu1 %v879_v0 }
  0xba   :  { %934 = vmatpush3.bf16.msra.mxu0 %v1056_v25  ;;  %884 = vmatprep.subr.bf16.mxu1 %v883_v1 }
  0xbb   :  { %936 = vmatprep.subr.bf16.mxu0 %v1060_v30 }
  0xbd   :  { %886 = vmatpush3.bf16.msra.mxu1 %v883_v1 }
  0xbe   :  { %938 = vmatpush3.bf16.msra.mxu0 %v1060_v30  ;;  %888 = vmatprep.subr.bf16.mxu1 %v887_v2 }
  0xc1   :  { %841 = vmatmul.mubr.msk.f32.vlgmr.msra.gmra.mrb[0].mxu0 %vm53_vm0, %v662_v11  ;;  %890 = vmatpush3.bf16.msra.mxu1 %v887_v2 }
  0xc4   :  { %784 = vmatmul.mubr.f32.vlgmr.msra.gmra.mrb[0].mxu1 %v144_v16 }
 0x194   :  { %v842_v13 = vpop.f32.mrb[0].mxu0 }
 0x195   :  { %v630_v22 = vpop.f32.mrb[1].mxu0 }
 0x197   :  { %v785_v14 = vpop.f32.mrb[0].mxu1 }
 0x198   :  { %v939_v23 = vadd.f32 %v842_v13, %v785_v14  ;;  %v354_v24 = vpop.f32.mrb[1].mxu1 }
 0x199   :  { %v940_v26 = vadd.f32 %v630_v22, %v354_v24 }
 0x19a   :  { %v641_v25 = vmul.f32 11.313708, %v939_v23 }
 0x19b   :  { %v640_v27 = vmul.f32 11.313708, %v940_v26 }
 0x19c   :  { %643 = vst [vmem:[#allocation5 + $0x8] sm:$0xff] %v641_v25 }
 0x19d   :  { %642 = vst [vmem:[#allocation5] sm:$0xff] %v640_v27 }
 0x19e   :  { %989 = shalt.err (!%p986_p12)
}
 0x19f   :  { %s990_s30 = scalar_lea.hbm %s1107_s2, 256 }
 0x1a0   :  { %p991_p13 = scmp.ne.s32.totalorder %s1107_s2, %s990_s30  ;;  %p994_p0 = scmp.lt.u32.totalorder %s990_s30, %s1107_s2 }
 0x1a2   :  { %p996_p1 = pnand %p994_p0, %p991_p13 }
 0x1a4   :  { %999 = shalt.err (!%p996_p1)
}
 0x1a5   :  { %655 = dma.vmem_to_hbm [thread:$0]  %s650_s1, 256, %s1107_s2, [#allocation4], %s1005_s19, %s1005_s19, %s1006_s20  }
 0x1a6   :  { %1002 = dma.done.wait [#allocation4], 256  }
 0x1a7   :  { %1003 = vsyncadd [#allocation4], 4294967040 }
 0x1a8   :  { %659 = vsyncpa [#allocation3], 1 }
 0x1a9   :  { %660 = vsyncpa [#allocation4], 1 }

// kernel: tpu_custom_call.1
= control target key start
LH: loop header
LB: loop body
LE: loop exit
PB: predicated region body
PF: predicated region fallthrough
CT: control target
= control target key end

     0   :  { %7 = vsyncpa [#allocation3], 0  ;;  %s1105_s0 = inlined_call_operand.vmem [shape: s32[16,1], index: 0, kind: input, shape index: {}]   ;;  %s1106_s1 = inlined_call_operand.hbm [shape: f32[64,128], index: 1, kind: input, shape index: {}]   ;;  %s1107_s2 = inlined_call_operand.hbm [shape: f32[16,128], index: 2, kind: output, shape index: {}]  }
   0x1   :  { %8 = vsyncpa [#allocation4], 0  ;;  %s1004_s9 = smov [#allocation2]   ;;  %s956_s13 = scalar_lea.hbm %s1106_s1, 1024 }
   0x2   :  { %s16_s10 = sshll.u32 %s1004_s9, 4  ;;  %p957_p0 = scmp.ne.s32.totalorder %s1106_s1, %s956_s13  ;;  %s17_s10 = int_to_ptr.vmem [resolvable:$true] %s16_s10 }
   0x3   :  { %p960_p1 = scmp.lt.u32.totalorder %s956_s13, %s1106_s1 }
   0x5   :  { %p962_p2 = pnand %p960_p1, %p957_p0 }
   0x7   :  { %965 = shalt.err (!%p962_p2)
}
   0x8   :  { %s966_s18 = scalar_lea.vmem %s17_s10, 1024  ;;  %p971_p4 = scmp.lt.s32.totalorder %s17_s10, %s17_s10 }
   0x9   :  { %p967_p3 = scmp.ne.s32.totalorder %s17_s10, %s966_s18  ;;  %p972_p5 = scmp.lt.s32.totalorder %s966_s18, %s966_s18 }
   0xb   :  { %p973_p6 = por %p972_p5, %p971_p4 }
   0xd   :  { %p974_p7 = pnand %p973_p6, %p967_p3 }
   0xf   :  { %977 = shalt.err (!%p974_p7)
}
  0x10   :  { %s1005_s19 = smov 128   ;;  %s1006_s20 = smov 8  }
  0x11   :  { %22 = dma.hbm_to_vmem [thread:$0]  %s1106_s1, 1024, %s17_s10, [#allocation3], %s1005_s19, %s1005_s19, %s1006_s20  }
  0x12   :  { %1000 = dma.done.wait [#allocation3], 1024  }
  0x13   :  { %1001 = vsyncadd [#allocation3], 4294966272  ;;  %v1007_v0 = vmov 0   ;;  %v26_v1 = vld [vmem:[%s1105_s0] sm:$0xff]  ;;  %v46_v3 = vld [vmem:[#allocation2 + $0x8] sm:$0xff]  ;;  %vm53_vm0 = vcmask 523264  }
  0x14   :  { %955 = vset.pattern.permute.xlu0 %v1007_v0  ;;  %v45_v2 = vld [vmem:[#allocation2] sm:$0xff]  ;;  %v47_v5 = vld [vmem:[#allocation2 + $0x10] sm:$0xff]  ;;  %v48_v6 = vld [vmem:[#allocation2 + $0x18] sm:$0xff]  ;;  %v64_v8 = vand.u32 4294901760, %v46_v3 }
  0x15   :  { %34 = vperm.xlu0 %955, %v26_v1   ;;  %v61_v4 = vand.u32 4294901760, %v45_v2  ;;  %v27_v7 = vld [vmem:[%s1105_s0 + $0x8] sm:$0xff]  ;;  %v67_v9 = vand.u32 4294901760, %v47_v5  ;;  %v70_v10 = vand.u32 4294901760, %v48_v6  ;;  %v49_v11 = vld [vmem:[#allocation2 + $0x20] sm:$0xff]  ;;  %v51_v17 = vld [vmem:[#allocation2 + $0x30] sm:$0xff] }
  0x16   :  { %v50_v12 = vld [vmem:[#allocation2 + $0x28] sm:$0xff]  ;;  %v73_v15 = vand.u32 4294901760, %v49_v11  ;;  %v52_v18 = vld [vmem:[#allocation2 + $0x38] sm:$0xff]  ;;  %v162_v20 = vsub.f32 %v46_v3, %v64_v8  ;;  %v79_v21 = vand.u32 4294901760, %v51_v17  ;;  %v28_v3 = vlaneseq  ;;  %s1009_s0 = smov [#allocation5]  }
  0x17   :  { %v1046_v13 = vpack.c.bf16 %v64_v8, %v61_v4  ;;  %v1048_v14 = vpack.c.bf16 %v70_v10, %v67_v9  ;;  %v76_v16 = vand.u32 4294901760, %v50_v12  ;;  %v155_v19 = vsub.f32 %v45_v2, %v61_v4  ;;  %s649_s1 = sshll.u32 %s1009_s0, 4  ;;  %s650_s1 = int_to_ptr.vmem [resolvable:$true] %s649_s1 }
  0x18   :  { %v82_v22 = vand.u32 4294901760, %v52_v18  ;;  %v163_v24 = vand.u32 4294901760, %v162_v20  ;;  %v169_v28 = vsub.f32 %v47_v5, %v67_v9  ;;  %v176_v29 = vsub.f32 %v48_v6, %v70_v10  ;;  %s978_s27 = scalar_lea.vmem %s650_s1, 256  ;;  %p983_p9 = scmp.lt.s32.totalorder %s650_s1, %s650_s1 }
  0x19   :  { %37 = vperm.xlu0 %955, %v27_v7   ;;  %892 = vmatprep.subr.bf16.mxu0 %v1046_v13  ;;  %v156_v23 = vand.u32 4294901760, %v155_v19  ;;  %v1056_v25 = vpack.c.bf16 %v76_v16, %v73_v15  ;;  %v183_v38 = vsub.f32 %v49_v11, %v73_v15  ;;  %v190_v39 = vsub.f32 %v50_v12, %v76_v16  ;;  %p979_p8 = scmp.ne.s32.totalorder %s650_s1, %s978_s27  ;;  %p984_p10 = scmp.lt.s32.totalorder %s978_s27, %s978_s27 }
  0x1a   :  { %844 = vmatprep.subr.bf16.mxu1 %v1046_v13  ;;  %894 = vmatpush3.bf16.msra.mxu0 %v1046_v13  ;;  %v164_v27 = vsub.f32 %v162_v20, %v163_v24  ;;  %v1060_v30 = vpack.c.bf16 %v82_v22, %v79_v21  ;;  %v170_v33 = vand.u32 4294901760, %v169_v28  ;;  %v177_v34 = vand.u32 4294901760, %v176_v29 }
  0x1b   :  { %846 = vmatpush3.bf16.msra.mxu1 %v1046_v13  ;;  %896 = vmatprep.subr.bf16.mxu0 %v1048_v14  ;;  %v157_v26 = vsub.f32 %v155_v19, %v156_v23  ;;  %v907_v40 = vpack.c.bf16 %v163_v24, %v156_v23  ;;  %v184_v44 = vand.u32 4294901760, %v183_v38  ;;  %v191_v45 = vand.u32 4294901760, %v190_v39  ;;  %p985_p11 = por %p984_p10, %p983_p9 }
  0x1c   :  { %848 = vmatprep.subr.bf16.mxu1 %v1048_v14  ;;  %v165_v32 = vand.u32 4294901760, %v164_v27  ;;  %v1064_v35 = vpack.c.bf16 %v177_v34, %v170_v33  ;;  %v171_v36 = vsub.f32 %v169_v28, %v170_v33  ;;  %v178_v37 = vsub.f32 %v176_v29, %v177_v34 }
  0x1d   :  { %v158_v31 = vand.u32 4294901760, %v157_v26  ;;  %v197_v47 = vsub.f32 %v51_v17, %v79_v21  ;;  %v204_v48 = vsub.f32 %v52_v18, %v82_v22  ;;  %v915_v49 = vpack.c.bf16 %v191_v45, %v184_v44  ;;  %p986_p12 = pnand %p985_p11, %p979_p8 }
  0x1e   :  { %898 = vmatpush3.bf16.msra.mxu0 %v1048_v14  ;;  %v172_v42 = vand.u32 4294901760, %v171_v36  ;;  %v179_v43 = vand.u32 4294901760, %v178_v37  ;;  %v185_v50 = vsub.f32 %v183_v38, %v184_v44  ;;  %v192_v51 = vsub.f32 %v190_v39, %v191_v45 }
  0x1f   :  { %850 = vmatpush3.bf16.msra.mxu1 %v1048_v14  ;;  %900 = vmatprep.subr.bf16.mxu0 %v1056_v25  ;;  %v859_v41 = vpack.c.bf16 %v165_v32, %v158_v31  ;;  %v198_v52 = vand.u32 4294901760, %v197_v47  ;;  %v205_v53 = vand.u32 4294901760, %v204_v48  ;;  %v875_v63 = vpack.c.bf16 %v162_v20, %v155_v19 }
  0x20   :  { %852 = vmatprep.subr.bf16.mxu1 %v1056_v25  ;;  %v863_v46 = vpack.c.bf16 %v179_v43, %v172_v42  ;;  %v186_v54 = vand.u32 4294901760, %v185_v50  ;;  %v193_v55 = vand.u32 4294901760, %v192_v51  ;;  %v879_v0 = vpack.c.bf16 %v176_v29, %v169_v28 }
  0x21   :  { %v919_v56 = vpack.c.bf16 %v205_v53, %v198_v52  ;;  %v199_v57 = vsub.f32 %v197_v47, %v198_v52  ;;  %v206_v58 = vsub.f32 %v204_v48, %v205_v53  ;;  %v883_v1 = vpack.c.bf16 %v190_v39, %v183_v38 }
  0x22   :  { %902 = vmatpush3.bf16.msra.mxu0 %v1056_v25  ;;  %v867_v59 = vpack.c.bf16 %v193_v55, %v186_v54  ;;  %v887_v2 = vpack.c.bf16 %v204_v48, %v197_v47  ;;  %v29_v4 = vand.u32 127, %v28_v3  ;;  %v1008_v6 = vmov 0.0  }
  0x23   :  { %854 = vmatpush3.bf16.msra.mxu1 %v1056_v25  ;;  %904 = vmatprep.subr.bf16.mxu0 %v1060_v30  ;;  %v200_v60 = vand.u32 4294901760, %v199_v57  ;;  %v207_v61 = vand.u32 4294901760, %v206_v58 }
  0x24   :  { %856 = vmatprep.subr.bf16.mxu1 %v1060_v30 }
  0x25   :  { %v871_v62 = vpack.c.bf16 %v207_v61, %v200_v60 }
  0x26   :  { %906 = vmatpush3.bf16.msra.mxu0 %v1060_v30 }
  0x27   :  { %858 = vmatpush3.bf16.msra.mxu1 %v1060_v30  ;;  %908 = vmatprep.subr.bf16.mxu0 %v907_v40 }
  0x28   :  { %860 = vmatprep.subr.bf16.mxu1 %v859_v41 }
  0x94   :  { %v35_v5 = vpop.permute.xlu0 %34 }
  0x95   :  { %vm39_vm1 = vcmp.eq.s32.totalorder %v29_v4, %v35_v5 }
  0x96   :  { %v661_v7 = vsel %vm39_vm1, 1.0, %v1008_v6 }
  0x97   :  { %v55_v8 = vsel %vm53_vm0, %v661_v7, 0 }
  0x98   :  { %v134_v9 = vsub.f32 %v55_v8, %v55_v8  ;;  %v38_v10 = vpop.permute.xlu0 %37 }
  0x99   :  { %vm40_vm2 = vcmp.eq.s32.totalorder %v29_v4, %v38_v10 }
  0x9a   :  { %v662_v11 = vsel %vm40_vm2, 1.0, %v1008_v6  ;;  %v135_v12 = vand.u32 4294901760, %v134_v9 }
  0x9b   :  { %v58_v15 = vsel %vm53_vm0, %v662_v11, 0 }
  0x9c   :  { %v144_v16 = vsub.f32 %v58_v15, %v58_v15  ;;  %802 = vmatprep.mubr.f32.mxu0 %v135_v12  ;;  %v136_v17 = vsub.f32 %v134_v9, %v135_v12 }
  0x9e   :  { %v137_v18 = vand.u32 4294901760, %v136_v17  ;;  %v145_v19 = vand.u32 4294901760, %v144_v16 }
  0xa0   :  { %745 = vmatprep.mubr.f32.mxu1 %v137_v18  ;;  %803 = vmatmul.mubr.f32.vlgmr.msra.gmra.mrb[0].mxu0 %v145_v19  ;;  %v146_v20 = vsub.f32 %v144_v16, %v145_v19 }
  0xa1   :  { %910 = vmatpush3.bf16.msra.mxu0 %v907_v40  ;;  %821 = vmatprep.mubr.msk.f32.mxu0 %vm53_vm0, %v661_v7 }
  0xa2   :  { %912 = vmatprep.subr.bf16.mxu0 %v1064_v35  ;;  %v147_v21 = vand.u32 4294901760, %v146_v20 }
  0xa4   :  { %746 = vmatmul.mubr.f32.vlgmr.msra.gmra.mrb[0].mxu1 %v147_v21 }
  0xa5   :  { %862 = vmatpush3.bf16.msra.mxu1 %v859_v41  ;;  %914 = vmatpush3.bf16.msra.mxu0 %v1064_v35 }
  0xa6   :  { %764 = vmatprep.mubr.msk.f32.mxu1 %vm53_vm0, %v661_v7  ;;  %864 = vmatprep.subr.bf16.mxu1 %v863_v46 }
  0xa7   :  { %916 = vmatprep.subr.bf16.mxu0 %v915_v49 }
  0xa9   :  { %866 = vmatpush3.bf16.msra.mxu1 %v863_v46  ;;  %918 = vmatpush3.bf16.msra.mxu0 %v915_v49 }
  0xaa   :  { %868 = vmatprep.subr.bf16.mxu1 %v867_v59  ;;  %920 = vmatprep.subr.bf16.mxu0 %v919_v56 }
  0xad   :  { %870 = vmatpush3.bf16.msra.mxu1 %v867_v59  ;;  %922 = vmatpush3.bf16.msra.mxu0 %v919_v56 }
  0xae   :  { %872 = vmatprep.subr.bf16.mxu1 %v871_v62  ;;  %924 = vmatprep.subr.bf16.mxu0 %v1046_v13 }
  0xb0   :  { %822 = vmatmul.mubr.msk.f32.vlgmr.msra.gmra.mrb[0].mxu0 %vm53_vm0, %v662_v11 }
  0xb1   :  { %874 = vmatpush3.bf16.msra.mxu1 %v871_v62  ;;  %926 = vmatpush3.bf16.msra.mxu0 %v1046_v13 }
  0xb2   :  { %840 = vmatprep.mubr.msk.f32.mxu0 %vm53_vm0, %v661_v7  ;;  %876 = vmatprep.subr.bf16.mxu1 %v875_v63 }
  0xb3   :  { %928 = vmatprep.subr.bf16.mxu0 %v1048_v14 }
  0xb4   :  { %765 = vmatmul.mubr.msk.f32.vlgmr.msra.gmra.mrb[0].mxu1 %vm53_vm0, %v662_v11 }
  0xb5   :  { %878 = vmatpush3.bf16.msra.mxu1 %v875_v63  ;;  %783 = vmatprep.mubr.f32.mxu1 %v134_v9 }
  0xb6   :  { %930 = vmatpush3.bf16.msra.mxu0 %v1048_v14  ;;  %880 = vmatprep.subr.bf16.mxu1 %v879_v0 }
  0xb7   :  { %932 = vmatprep.subr.bf16.mxu0 %v1056_v25 }
  0xb9   :  { %882 = vmatpush3.bf16.msra.mxu1 %v879_v0 }
  0xba   :  { %934 = vmatpush3.bf16.msra.mxu0 %v1056_v25  ;;  %884 = vmatprep.subr.bf16.mxu1 %v883_v1 }
  0xbb   :  { %936 = vmatprep.subr.bf16.mxu0 %v1060_v30 }
  0xbd   :  { %886 = vmatpush3.bf16.msra.mxu1 %v883_v1 }
  0xbe   :  { %938 = vmatpush3.bf16.msra.mxu0 %v1060_v30  ;;  %888 = vmatprep.subr.bf16.mxu1 %v887_v2 }
  0xc1   :  { %841 = vmatmul.mubr.msk.f32.vlgmr.msra.gmra.mrb[0].mxu0 %vm53_vm0, %v662_v11  ;;  %890 = vmatpush3.bf16.msra.mxu1 %v887_v2 }
  0xc4   :  { %784 = vmatmul.mubr.f32.vlgmr.msra.gmra.mrb[0].mxu1 %v144_v16 }
 0x194   :  { %v842_v13 = vpop.f32.mrb[0].mxu0 }
 0x195   :  { %v630_v22 = vpop.f32.mrb[1].mxu0 }
 0x197   :  { %v785_v14 = vpop.f32.mrb[0].mxu1 }
 0x198   :  { %v939_v23 = vadd.f32 %v842_v13, %v785_v14  ;;  %v354_v24 = vpop.f32.mrb[1].mxu1 }
 0x199   :  { %v940_v26 = vadd.f32 %v630_v22, %v354_v24 }
 0x19a   :  { %v641_v25 = vmul.f32 11.313708, %v939_v23 }
 0x19b   :  { %v640_v27 = vmul.f32 11.313708, %v940_v26 }
 0x19c   :  { %643 = vst [vmem:[#allocation5 + $0x8] sm:$0xff] %v641_v25 }
 0x19d   :  { %642 = vst [vmem:[#allocation5] sm:$0xff] %v640_v27 }
 0x19e   :  { %989 = shalt.err (!%p986_p12)
}
 0x19f   :  { %s990_s30 = scalar_lea.hbm %s1107_s2, 256 }
 0x1a0   :  { %p991_p13 = scmp.ne.s32.totalorder %s1107_s2, %s990_s30  ;;  %p994_p0 = scmp.lt.u32.totalorder %s990_s30, %s1107_s2 }
 0x1a2   :  { %p996_p1 = pnand %p994_p0, %p991_p13 }
 0x1a4   :  { %999 = shalt.err (!%p996_p1)
}
 0x1a5   :  { %655 = dma.vmem_to_hbm [thread:$0]  %s650_s1, 256, %s1107_s2, [#allocation4], %s1005_s19, %s1005_s19, %s1006_s20  }
 0x1a6   :  { %1002 = dma.done.wait [#allocation4], 256  }
 0x1a7   :  { %1003 = vsyncadd [#allocation4], 4294967040 }
 0x1a8   :  { %659 = vsyncpa [#allocation3], 1 }
 0x1a9   :  { %660 = vsyncpa [#allocation4], 1 }

</bundles_post_ra>
